<compile_context>
chip_gen: v7x
topology: tpu7x:2x2x1
jax: 0.10.0
libtpu: 0.0.40
codegen_flags: <defaults>
</compile_context>

<pallas_src>
import jax
import jax.numpy as jnp
from jax import lax
from jax.experimental import pallas as pl
from jax.experimental.pallas import tpu as pltpu


def _make_vq_kernel(Kp):
    """Build the per-tile kernel (Kp is a static Python int)."""

    def kernel(z_ref, eneg2_ref, et_ref, esq_ref, zvq_ref, err_ref, idx_ref):
        # z_ref:     (D, tT)   one time-slab of one batch element (native dtype)
        # eneg2_ref: (Kp, D)   -2 * zero-padded codebook (resident)
        # et_ref:    (D, Kp)   codebook transpose (resident, unscaled)
        # esq_ref:   (Kp, 1)   ||e_k||^2, padded rows set huge
        # zvq_ref:   (D, tT)   quantized output slab (lane-dense)
        # err_ref:   (1, tT)   per-frame squared error ||z_vq - z||^2
        # idx_ref:   (1, tT)   per-frame chosen code index (int32)
        z = z_ref[...].astype(jnp.float32)                                 # (D, tT)

        # distances up to a per-frame constant: ||e||^2 - 2 e.z   (MXU)
        dots = lax.dot_general(eneg2_ref[...], z, (((1,), (0,)), ((), ())),
                               preferred_element_type=jnp.float32)         # (Kp, tT)
        dist = esq_ref[...] + dots                                         # (Kp, tT)

        # argmin over codes (sublane axis), first-occurrence tie-break
        min_d = jnp.min(dist, axis=0, keepdims=True)                       # (1, tT)
        row = lax.broadcasted_iota(jnp.int32, (Kp, 1), 0)                  # (Kp, 1)
        idx = jnp.min(jnp.where(dist <= min_d, row, Kp),
                      axis=0, keepdims=True)                               # (1, tT)
        onehot = (row == idx).astype(jnp.float32)                          # (Kp, tT)

        # codebook lookup on the MXU: e^T @ onehot -> (D, tT), exact codebook rows
        z_vq = lax.dot_general(et_ref[...], onehot, (((1,), (0,)), ((), ())),
                               preferred_element_type=jnp.float32)
        zvq_ref[...] = z_vq.astype(zvq_ref.dtype)

        # per-frame squared error; ragged-tail garbage columns land out-of-bounds and
        # are clipped by Pallas on writeback, so no masking is required here.
        diff = z_vq - z
        err_ref[...] = jnp.sum(diff * diff, axis=0, keepdims=True)         # (1, tT)
        idx_ref[...] = idx                                                 # (1, tT)

    return kernel


def _pick_time_tile(T, Kp, D, max_t_tile, vmem_budget_bytes):
    """Largest multiple-of-128 time tile whose temporaries fit the VMEM budget."""
    if T <= 128:
        return T
    # rough per-column bytes: (Kp,tT) f32 temporaries (dots, dist, select, onehot, ...)
    # + (D,tT) buffers (double-buffered z in / z_vq out, diff, squares) + tiny outputs.
    bytes_per_col = 4 * (6 * Kp + 8 * D) + 32
    fit = (vmem_budget_bytes // bytes_per_col) // 128 * 128
    fit = max(128, fit)
    return min(max_t_tile, fit, (T // 128) * 128)


def vector_quantizer_forward(z, embeddings, *, reduction="frame_mean",
                             time_last=True, max_t_tile=2048,
                             vmem_budget_bytes=20 * 1024 * 1024):
    """Forward pass of VectorQuantizer (normalize=False).

    z:          (B, D, T) if time_last else (B, T, D)
    embeddings: (K, D) codebook
    returns (z_vq, z_qut_loss, z_enc_loss, update_detail)
    """
    # TODO(synk): normalize=True (target_norm row-normalization) not implemented.
    if not time_last:
        z = jnp.transpose(z, (0, 2, 1))          # kernel works in (B, D, T)
    B, D, T = z.shape
    K, De = embeddings.shape
    assert De == D, "codebook dim mismatch"
    N = B * T
    out_dtype = z.dtype                          # keep native dtype through the DMA

    emb = embeddings.astype(jnp.float32)
    # Pad codebook so the code axis is lane-dense; padded codes can never win.
    Kp = ((K + 127) // 128) * 128
    e_pad = jnp.zeros((Kp, D), jnp.float32).at[:K].set(emb)
    e_neg2 = -2.0 * e_pad                                              # (Kp, D)
    e_t = e_pad.T                                                      # (D, Kp)
    e_sq = jnp.sum(emb * emb, axis=1, keepdims=True)                   # (K, 1)
    e_sq_pad = jnp.full((Kp, 1), 1e30, jnp.float32).at[:K].set(e_sq)   # (Kp, 1)

    tT = _pick_time_tile(T, Kp, D, max_t_tile, vmem_budget_bytes)
    nT = pl.cdiv(T, tT)
    grid = (B, nT)

    kernel = _make_vq_kernel(Kp)

    out_shapes = (
        jax.ShapeDtypeStruct((B, D, T), out_dtype),     # z_vq (same layout/dtype as input)
        jax.ShapeDtypeStruct((B, 1, T), jnp.float32),   # per-frame squared error
        jax.ShapeDtypeStruct((B, 1, T), jnp.int32),     # per-frame chosen code index
    )

    z_vq, frame_err, idx = pl.pallas_call(
        kernel,
        out_shape=out_shapes,
        grid_spec=pltpu.PrefetchScalarGridSpec(
            num_scalar_prefetch=0,
            grid=grid,
            in_specs=[
                pl.BlockSpec((None, D, tT), lambda b, t: (b, 0, t)),   # z slab -> (D, tT)
                pl.BlockSpec((Kp, D), lambda b, t: (0, 0)),            # -2 * codebook (resident)
                pl.BlockSpec((D, Kp), lambda b, t: (0, 0)),            # codebook^T (resident)
                pl.BlockSpec((Kp, 1), lambda b, t: (0, 0)),            # ||e||^2 (padded huge)
            ],
            out_specs=[
                pl.BlockSpec((None, D, tT), lambda b, t: (b, 0, t)),
                pl.BlockSpec((None, 1, tT), lambda b, t: (b, 0, t)),
                pl.BlockSpec((None, 1, tT), lambda b, t: (b, 0, t)),
            ],
        ),
        compiler_params=pltpu.CompilerParams(
            dimension_semantics=("parallel", "parallel"),
            vmem_limit_bytes=48 * 1024 * 1024,
        ),
    )(z, e_neg2, e_t, e_sq_pad)

    loss_sum = jnp.sum(frame_err)

    # With normalize=False, z_qut_loss and z_enc_loss have identical forward values.
    if reduction == "sum":
        z_qut_loss = z_enc_loss = loss_sum
    elif reduction == "mean":
        z_qut_loss = z_enc_loss = loss_sum / (N * D)
    elif reduction == "batch_mean":
        z_qut_loss = z_enc_loss = loss_sum / B
    elif reduction == "frame_mean":
        z_qut_loss = z_enc_loss = loss_sum / (B * T)
    else:
        # TODO(synk): reduction='none' (per-element loss tensors) not implemented.
        raise NotImplementedError(f"reduction={reduction}")

    # code-usage statistics from the per-frame indices (tiny scatter-add in the wrapper)
    counts = jnp.zeros((K,), jnp.float32).at[idx.reshape(-1)].add(1.0)
    avg_probs = counts / N
    perplexity = jnp.exp(-jnp.sum(avg_probs * jnp.log(avg_probs + 1e-10)))
    update_detail = {"entropy": perplexity}

    # Straight-through: forward value of z + (z_vq - z).detach() is z_vq.
    # TODO(synk): wrap in jax.custom_vjp for training-time straight-through gradients.
    if not time_last:
        z_vq = jnp.transpose(z_vq, (0, 2, 1))

    return z_vq, z_qut_loss, z_enc_loss, update_detail


if __name__ == "__main__":
    key = jax.random.PRNGKey(0)
    k_z, k_e, k_z2, k_e2 = jax.random.split(key, 4)

    # ---- test 1: module config z_num=64 codes, z_dim=32; input z is (B, D, T) ----
    B, D, T = 2, 32, 8
    z_num = 64

    z = jax.random.normal(k_z, (B, D, T), dtype=jnp.float32)
    embeddings = jax.random.normal(k_e, (z_num, D), dtype=jnp.float32)

    z_vq, z_qut_loss, z_enc_loss, detail = vector_quantizer_forward(
        z, embeddings, reduction="frame_mean", time_last=True)
    jax.block_until_ready((z_vq, z_qut_loss, z_enc_loss, detail["entropy"]))

    # pure-JAX reference
    zf = jnp.transpose(z, (0, 2, 1)).reshape(-1, D)
    dist = (jnp.sum(zf ** 2, axis=1, keepdims=True)
            + jnp.sum(embeddings ** 2, axis=1)
            - 2.0 * zf @ embeddings.T)
    idx_ref = jnp.argmin(dist, axis=1)
    zvq_ref_flat = embeddings[idx_ref]
    loss_ref = jnp.sum((zvq_ref_flat - zf) ** 2) / (B * T)
    counts_ref = jnp.sum(jax.nn.one_hot(idx_ref, z_num), axis=0)
    probs_ref = counts_ref / (B * T)
    ppl_ref = jnp.exp(-jnp.sum(probs_ref * jnp.log(probs_ref + 1e-10)))
    zvq_ref = jnp.transpose(zvq_ref_flat.reshape(B, T, D), (0, 2, 1))

    assert jnp.allclose(z_vq, zvq_ref, atol=1e-5), "z_vq mismatch"
    assert jnp.allclose(z_qut_loss, loss_ref, atol=1e-5), "qut loss mismatch"
    assert jnp.allclose(z_enc_loss, loss_ref, atol=1e-5), "enc loss mismatch"
    assert jnp.allclose(detail["entropy"], ppl_ref, atol=1e-4), "perplexity mismatch"

    # ---- test 2: larger T exercising the lane-dense tile + clipped ragged tail ----
    B2, D2, T2, K2 = 2, 32, 300, 64
    z2 = jax.random.normal(k_z2, (B2, D2, T2), dtype=jnp.float32)
    e2 = jax.random.normal(k_e2, (K2, D2), dtype=jnp.float32)
    z_vq2, qut2, enc2, det2 = vector_quantizer_forward(z2, e2)
    jax.block_until_ready((z_vq2, qut2, enc2, det2["entropy"]))

    zf2 = jnp.transpose(z2, (0, 2, 1)).reshape(-1, D2)
    zv2 = jnp.transpose(z_vq2, (0, 2, 1)).reshape(-1, D2)
    # every output frame is (numerically exactly) some codebook row
    d_to_codes = jnp.min(jnp.sum((zv2[:, None, :] - e2[None, :, :]) ** 2, axis=-1), axis=1)
    assert jnp.max(d_to_codes) < 1e-6, "z_vq not on the codebook"
    # chosen code is the nearest one (tie-robust check)
    d_chosen = jnp.sum((zv2 - zf2) ** 2, axis=1)
    d_best = jnp.min(jnp.sum((zf2[:, None, :] - e2[None, :, :]) ** 2, axis=-1), axis=1)
    assert jnp.max(d_chosen - d_best) < 1e-3, "non-optimal code chosen"
    assert jnp.allclose(qut2, jnp.sum(d_chosen) / (B2 * T2), rtol=1e-4, atol=1e-3), \
        "loss inconsistent with outputs"
    assert bool(jnp.isfinite(det2["entropy"])), "perplexity not finite"

    print("KERNEL_OK")
</pallas_src>

<mosaic_0001>
module attributes {stable_mosaic.version = 11 : i64} {
  func.func @kernel(%arg0: i32, %arg1: i32, %arg2: memref<1x32x8xf32, #tpu.memory_space<vmem>>, %arg3: memref<128x32xf32, #tpu.memory_space<vmem>>, %arg4: memref<32x128xf32, #tpu.memory_space<vmem>>, %arg5: memref<128x1xf32, #tpu.memory_space<vmem>>, %arg6: memref<1x32x8xf32, #tpu.memory_space<vmem>>, %arg7: memref<1x1x8xf32, #tpu.memory_space<vmem>>, %arg8: memref<1x1x8xi32, #tpu.memory_space<vmem>>) attributes {dimension_semantics = [#tpu.dimension_semantics<parallel>, #tpu.dimension_semantics<parallel>], iteration_bounds = array<i64: 2, 1>, scalar_prefetch = 0 : i64, scratch_operands = 0 : i64, tpu.core_type = #tpu.core_type<tc>, window_params = [{transform_indices = @transform_0, window_bounds = array<i64: 1, 32, 8>}, {pipeline_mode = #tpu.pipeline_mode<synchronous>, transform_indices = @transform_1, window_bounds = array<i64: 128, 32>}, {pipeline_mode = #tpu.pipeline_mode<synchronous>, transform_indices = @transform_2, window_bounds = array<i64: 32, 128>}, {pipeline_mode = #tpu.pipeline_mode<synchronous>, transform_indices = @transform_3, window_bounds = array<i64: 128, 1>}, {transform_indices = @transform_4, window_bounds = array<i64: 1, 32, 8>}, {transform_indices = @transform_5, window_bounds = array<i64: 1, 1, 8>}, {transform_indices = @transform_6, window_bounds = array<i64: 1, 1, 8>}]} {
    %c0 = arith.constant 0 : index
    %c0_0 = arith.constant 0 : index
    %c0_1 = arith.constant 0 : index
    %0 = vector.load %arg2[%c0, %c0_0, %c0_1] : memref<1x32x8xf32, #tpu.memory_space<vmem>>, vector<1x32x8xf32>
    %1 = vector.shape_cast %0 : vector<1x32x8xf32> to vector<32x8xf32>
    %c0_2 = arith.constant 0 : index
    %c0_3 = arith.constant 0 : index
    %2 = vector.load %arg3[%c0_2, %c0_3] : memref<128x32xf32, #tpu.memory_space<vmem>>, vector<128x32xf32>
    %cst = arith.constant dense<0.000000e+00> : vector<128x8xf32>
    %3 = tpu.matmul %2, %1, %cst {dimension_numbers = #tpu.dot_dimension_numbers<[1], [0], [0], [1], [0, 0, 1, 1], [], []>} : vector<128x32xf32>, vector<32x8xf32>, vector<128x8xf32> -> vector<128x8xf32>
    %c0_4 = arith.constant 0 : index
    %c0_5 = arith.constant 0 : index
    %4 = vector.load %arg5[%c0_4, %c0_5] : memref<128x1xf32, #tpu.memory_space<vmem>>, vector<128x1xf32>
    %5 = vector.broadcast %4 : vector<128x1xf32> to vector<128x8xf32>
    %6 = arith.addf %5, %3 : vector<128x8xf32>
    %cst_6 = arith.constant dense<0x7F800000> : vector<8xf32>
    %7 = vector.multi_reduction <minimumf>, %6, %cst_6 [0] : vector<128x8xf32> to vector<8xf32>
    %8 = vector.shape_cast %7 : vector<8xf32> to vector<1x8xf32>
    %9 = tpu.iota {dimensions = array<i32: 0>} : vector<128x1xi32>
    %10 = vector.broadcast %8 : vector<1x8xf32> to vector<128x8xf32>
    %11 = arith.cmpf ole, %6, %10 : vector<128x8xf32>
    %c128_i32 = arith.constant 128 : i32
    %12 = vector.shape_cast %9 : vector<128x1xi32> to vector<128x1xi32>
    %13 = vector.broadcast %12 : vector<128x1xi32> to vector<128x8xi32>
    %14 = vector.broadcast %c128_i32 : i32 to vector<128x8xi32>
    %15 = arith.select %11, %13, %14 : vector<128x8xi1>, vector<128x8xi32>
    %cst_7 = arith.constant dense<2147483647> : vector<8xi32>
    %16 = vector.multi_reduction <minsi>, %15, %cst_7 [0] : vector<128x8xi32> to vector<8xi32>
    %17 = vector.shape_cast %16 : vector<8xi32> to vector<1x8xi32>
    %18 = vector.broadcast %9 : vector<128x1xi32> to vector<128x8xi32>
    %19 = vector.broadcast %17 : vector<1x8xi32> to vector<128x8xi32>
    %20 = arith.cmpi eq, %18, %19 : vector<128x8xi32>
    %21 = arith.extui %20 : vector<128x8xi1> to vector<128x8xi32>
    %22 = arith.sitofp %21 : vector<128x8xi32> to vector<128x8xf32>
    %c0_8 = arith.constant 0 : index
    %c0_9 = arith.constant 0 : index
    %23 = vector.load %arg4[%c0_8, %c0_9] : memref<32x128xf32, #tpu.memory_space<vmem>>, vector<32x128xf32>
    %cst_10 = arith.constant dense<0.000000e+00> : vector<32x8xf32>
    %24 = tpu.matmul %23, %22, %cst_10 {dimension_numbers = #tpu.dot_dimension_numbers<[1], [0], [0], [1], [0, 0, 1, 1], [], []>} : vector<32x128xf32>, vector<128x8xf32>, vector<32x8xf32> -> vector<32x8xf32>
    %c0_11 = arith.constant 0 : index
    %c0_12 = arith.constant 0 : index
    %c0_13 = arith.constant 0 : index
    %25 = vector.load %arg6[%c0_11, %c0_12, %c0_13] : memref<1x32x8xf32, #tpu.memory_space<vmem>>, vector<1x32x8xf32>
    %26 = vector.shape_cast %25 : vector<1x32x8xf32> to vector<32x8xf32>
    %27 = vector.shape_cast %24 : vector<32x8xf32> to vector<1x32x8xf32>
    tpu.vector_store %arg6[%c0_11, %c0_12, %c0_13], %27 {strides = array<i32>} : memref<1x32x8xf32, #tpu.memory_space<vmem>>, vector<1x32x8xf32>,
    %28 = arith.subf %24, %1 : vector<32x8xf32>
    %29 = arith.mulf %28, %28 : vector<32x8xf32>
    %cst_14 = arith.constant dense<0.000000e+00> : vector<8xf32>
    %30 = vector.multi_reduction <add>, %29, %cst_14 [0] : vector<32x8xf32> to vector<8xf32>
    %31 = vector.shape_cast %30 : vector<8xf32> to vector<1x8xf32>
    %c0_15 = arith.constant 0 : index
    %c0_16 = arith.constant 0 : index
    %c0_17 = arith.constant 0 : index
    %32 = vector.load %arg7[%c0_15, %c0_16, %c0_17] : memref<1x1x8xf32, #tpu.memory_space<vmem>>, vector<1x1x8xf32>
    %33 = vector.shape_cast %32 : vector<1x1x8xf32> to vector<1x8xf32>
    %34 = vector.shape_cast %31 : vector<1x8xf32> to vector<1x1x8xf32>
    tpu.vector_store %arg7[%c0_15, %c0_16, %c0_17], %34 {strides = array<i32>} : memref<1x1x8xf32, #tpu.memory_space<vmem>>, vector<1x1x8xf32>,
    %c0_18 = arith.constant 0 : index
    %c0_19 = arith.constant 0 : index
    %c0_20 = arith.constant 0 : index
    %35 = vector.load %arg8[%c0_18, %c0_19, %c0_20] : memref<1x1x8xi32, #tpu.memory_space<vmem>>, vector<1x1x8xi32>
    %36 = vector.shape_cast %35 : vector<1x1x8xi32> to vector<1x8xi32>
    %37 = vector.shape_cast %17 : vector<1x8xi32> to vector<1x1x8xi32>
    tpu.vector_store %arg8[%c0_18, %c0_19, %c0_20], %37 {strides = array<i32>} : memref<1x1x8xi32, #tpu.memory_space<vmem>>, vector<1x1x8xi32>,
    return
  }
  func.func @transform_0(%arg0: i32, %arg1: i32) -> (i32, i32, i32) {
    %c0_i32 = arith.constant 0 : i32
    %c0_i32_0 = arith.constant 0 : i32
    return %arg0, %c0_i32, %arg1 : i32, i32, i32
  }
  func.func @transform_1(%arg0: i32, %arg1: i32) -> (i32, i32) {
    %c0_i32 = arith.constant 0 : i32
    %c0_i32_0 = arith.constant 0 : i32
    %c0_i32_1 = arith.constant 0 : i32
    return %c0_i32, %c0_i32_0 : i32, i32
  }
  func.func @transform_2(%arg0: i32, %arg1: i32) -> (i32, i32) {
    %c0_i32 = arith.constant 0 : i32
    %c0_i32_0 = arith.constant 0 : i32
    %c0_i32_1 = arith.constant 0 : i32
    return %c0_i32, %c0_i32_0 : i32, i32
  }
  func.func @transform_3(%arg0: i32, %arg1: i32) -> (i32, i32) {
    %c0_i32 = arith.constant 0 : i32
    %c0_i32_0 = arith.constant 0 : i32
    %c0_i32_1 = arith.constant 0 : i32
    return %c0_i32, %c0_i32_0 : i32, i32
  }
  func.func @transform_4(%arg0: i32, %arg1: i32) -> (i32, i32, i32) {
    %c0_i32 = arith.constant 0 : i32
    %c0_i32_0 = arith.constant 0 : i32
    return %arg0, %c0_i32, %arg1 : i32, i32, i32
  }
  func.func @transform_5(%arg0: i32, %arg1: i32) -> (i32, i32, i32) {
    %c0_i32 = arith.constant 0 : i32
    %c0_i32_0 = arith.constant 0 : i32
    return %arg0, %c0_i32, %arg1 : i32, i32, i32
  }
  func.func @transform_6(%arg0: i32, %arg1: i32) -> (i32, i32, i32) {
    %c0_i32 = arith.constant 0 : i32
    %c0_i32_0 = arith.constant 0 : i32
    return %arg0, %c0_i32, %arg1 : i32, i32, i32
  }
}

</mosaic_0001>

<bundles_post_ra>
// kernel: tpu_custom_call.1
= control target key start
LH: loop header
LB: loop body
LE: loop exit
PB: predicated region body
PF: predicated region fallthrough
CT: control target
= control target key end

     0   :  { %12 = vsyncpa [#allocation3], 0  ;;  %s2044_s0 = inlined_call_operand.vmem [shape: f32[2,32,8], index: 0, kind: input, shape index: {}]   ;;  %s2045_s1 = inlined_call_operand.vmem [shape: f32[128,32], index: 1, kind: input, shape index: {}]   ;;  %s2046_s2 = inlined_call_operand.vmem [shape: f32[32,128], index: 2, kind: input, shape index: {}]   ;;  %s2047_s3 = inlined_call_operand.vmem [shape: f32[128,1], index: 3, kind: input, shape index: {}]   ;;  %s2048_s4 = inlined_call_operand.vmem [shape: f32[2,32,8], index: 4, kind: output, shape index: {0}]   ;;  %s2049_s5 = inlined_call_operand.hbm [shape: f32[2,1,8], index: 5, kind: output, shape index: {1}]   ;;  %s2050_s6 = inlined_call_operand.hbm [shape: s32[2,1,8], index: 6, kind: output, shape index: {2}]  }
   0x1   :  { %14 = vsyncpa [#allocation3 + $0x1], 0 }
   0x2   :  { %15 = vsyncpa [#allocation5], 0 }
   0x3   :  { %17 = vsyncpa [#allocation5 + $0x1], 0  ;;  %s1545_s21 = smov 0   ;;  %s1547_s22 = smov 0  }
   0x4   :  { %s1549_s23 = smov 0   ;;  %s1551_s24 = smov 0  }
   0x5   :  { %s1553_s25 = smov 0   ;;  %s1555_s26 = smov 0  }
   0x6 LB: > { %s1117_s27 = sadd.s32 4294967295, %s1504_s26   ;;  %s1118_s28 = sadd.s32 4294967294, %s1504_s26   ;;  %s1504_s26 = sphi %s1555_s26, %s23_s26   ;;  %s1500_s25 = sphi %s1553_s25, %s2059_s25   ;;  %s1496_s24 = sphi %s1551_s24, %s2058_s24   ;;  %s1492_s23 = sphi %s1549_s23, %s2057_s23   ;;  %s1488_s22 = sphi %s1547_s22, %s2056_s22   ;;  %s1484_s21 = sphi %s1545_s21, %s2055_s21  }
   0x7   : > { %s35_s29 = sadd.s32 1, %s1500_s25  ;;  %s163_s30 = sadd.s32 1, %s1492_s23 }
   0x8   : > { %p37_p0 = scmp.ge.s32.totalorder %s35_s29, 2  ;;  %p173_p1 = scmp.ne.s32.totalorder %s1492_s23, %s1488_s22 }
   0x9   : > { %p174_p2 = scmp.eq.s32.totalorder %s1117_s27, 1  ;;  %p179_p3 = scmp.ne.s32.totalorder %s1488_s22, %s1484_s21 }
   0xa   : > { %s2061_s29 = smov (%p37_p0, %s35_s29), 0  ;;  %p180_p5 = scmp.eq.s32.totalorder %s1118_s28, 1 }
   0xb   : > { %p1585_p4 = por %p174_p2, %p173_p1  ;;  %s158_s8 = ssub.s32 %s1500_s25, %s2061_s29 }
   0xc   : > { %p1121_p6 = scmp.ge.s32.totalorder %s1504_s26, 1  ;;  %p161_p7 = scmp.eq.s32.totalorder %s158_s8, 0 }
   0xd   : > { %p1592_p8 = por %p180_p5, %p179_p3  ;;  %p246_p9 = scmp.lt.s32.totalorder %s1504_s26, 3 }
   0xe   : > { %s1598_s10 = scalar_select %p161_p7, %s1492_s23, %s163_s30  }
   0xf   : > { %p247_p10 = pnand %p1121_p6, %p246_p9 }
  0x10   : > { %p290_p11 = scmp.lt.s32.totalorder (!%p247_p10), %s1496_s24, 1  ;;  %v310_v0 = vld [vmem:[%s2045_s1] sm:$0xff] (!%p247_p10)  ;;  %vm326_vm0 = vcmask (!%p247_p10), 261120   ;;  %v1506_v1 = vmov (!%p247_p10), 0   ;;  %v522_v2 = vld [vmem:[%s2047_s3 + $0x10] sm:$0xff] (!%p247_p10)  ;;  %v523_v9 = vld [vmem:[%s2047_s3 + $0x18] sm:$0xff] (!%p247_p10) }
  0x11   : > { %250 = sbr.rel (%p247_p10) target bundleno = 623 (0x26f), region = 36  ;;  %1228 = vmatprep.mubr.msk.f32.mxu0 (!%p247_p10), %vm326_vm0, %v310_v0  ;;  %1393 = vset.pattern.permute.xlu1 (!%p247_p10), %v1506_v1  ;;  %v520_v3 = vld [vmem:[%s2047_s3] sm:$0xff] (!%p247_p10)  ;;  %v521_v11 = vld [vmem:[%s2047_s3 + $0x8] sm:$0xff] (!%p247_p10)  ;;  %v312_v15 = vld [vmem:[%s2045_s1 + $0x10] sm:$0xff] (!%p247_p10)  ;;  %vm632_vm1 = vcmask (!%p247_p10), 64512   ;;  %s1913_s28 = sand.u32 (!%p247_p10), 1, %s1488_s22  }
  0x12   : > { %1392 = vset.pattern.permute.xlu0 (!%p247_p10), %v1506_v1  ;;  %548 = vperm.xlu1 (!%p247_p10), %1393, %v522_v2   ;;  %v525_v12 = vld [vmem:[%s2047_s3 + $0x28] sm:$0xff] (!%p247_p10)  ;;  %v524_v13 = vld [vmem:[%s2047_s3 + $0x20] sm:$0xff] (!%p247_p10)  ;;  %v527_v16 = vld [vmem:[%s2047_s3 + $0x38] sm:$0xff] (!%p247_p10)  ;;  %s289_s30 = scalar_lea.vmem (!%p247_p10), [#allocation4], %s1913_s28  ;;  %s2051_s18 = sshll.u32 (!%p247_p10), %s1496_s24, 4 }
  0x13   : > { %538 = vperm.xlu0 (!%p247_p10), %1392, %v520_v3   ;;  %v311_v14 = vld [vmem:[%s2045_s1 + $0x8] sm:$0xff] (!%p247_p10)  ;;  %v526_v17 = vld [vmem:[%s2047_s3 + $0x30] sm:$0xff] (!%p247_p10)  ;;  %v313_v18 = vld [vmem:[%s2045_s1 + $0x18] sm:$0xff] (!%p247_p10)  ;;  %s1950_s27 = scalar_lea.hbm (!%p247_p10), %s2050_s6, %s2051_s18  ;;  %s982_s8 = sshll.u32 (!%p247_p10), %s289_s30, 4  ;;  %s983_s8 = int_to_ptr.vmem [resolvable:$true] %s982_s8 }
  0x14   : > { %v314_v19 = vld [vmem:[%s2045_s1 + $0x20] sm:$0xff] (!%p247_p10)  ;;  %v529_v20 = vld [vmem:[%s2047_s3 + $0x48] sm:$0xff] (!%p247_p10)  ;;  %v316_v23 = vld [vmem:[%s2045_s1 + $0x30] sm:$0xff] (!%p247_p10)  ;;  %s952_s11 = scalar_lea.sflag (!%p247_p10), [#allocation5], %s1913_s28  ;;  %s1394_s12 = scalar_lea.vmem (!%p247_p10), %s983_s8, 16 }
  0x15   : > { %v528_v21 = vld [vmem:[%s2047_s3 + $0x40] sm:$0xff] (!%p247_p10)  ;;  %v315_v22 = vld [vmem:[%s2045_s1 + $0x28] sm:$0xff] (!%p247_p10)  ;;  %v531_v24 = vld [vmem:[%s2047_s3 + $0x58] sm:$0xff] (!%p247_p10)  ;;  %p1395_p12 = scmp.ne.s32.totalorder (!%p247_p10), %s983_s8, %s1394_s12  ;;  %s1508_s15 = smov (!%p247_p10), [#allocation4]  }
  0x16   : > { %553 = vperm.xlu1 (!%p247_p10), %1393, %v523_v9   ;;  %v530_v25 = vld [vmem:[%s2047_s3 + $0x50] sm:$0xff] (!%p247_p10)  ;;  %v317_v26 = vld [vmem:[%s2045_s1 + $0x38] sm:$0xff] (!%p247_p10)  ;;  %v318_v27 = vld [vmem:[%s2045_s1 + $0x40] sm:$0xff] (!%p247_p10)  ;;  %s1398_s16 = sshll.u32 (!%p247_p10), %s1508_s15, 4  ;;  %s1399_s16 = int_to_ptr.vmem [resolvable:$false] %s1398_s16 }
  0x17   : > { %543 = vperm.xlu0 (!%p247_p10), %1392, %v521_v11   ;;  %v533_v28 = vld [vmem:[%s2047_s3 + $0x68] sm:$0xff] (!%p247_p10)  ;;  %v532_v29 = vld [vmem:[%s2047_s3 + $0x60] sm:$0xff] (!%p247_p10)  ;;  %v320_v31 = vld [vmem:[%s2045_s1 + $0x50] sm:$0xff] (!%p247_p10)  ;;  %p1396_p13 = pnand (!%p247_p10), %p1395_p12, %p1585_p4  ;;  %p1401_p1 = scmp.lt.s32.totalorder (!%p247_p10), %s983_s8, %s1399_s16 }
  0x18   : > { %s1606_s13 = scalar_select %p290_p11, %s1496_s24, 1  ;;  %v319_v30 = vld [vmem:[%s2045_s1 + $0x48] sm:$0xff]  ;;  %v535_v32 = vld [vmem:[%s2047_s3 + $0x78] sm:$0xff]  ;;  %v534_v33 = vld [vmem:[%s2047_s3 + $0x70] sm:$0xff] }
  0x19   : > { %v321_v34 = vld [vmem:[%s2045_s1 + $0x58] sm:$0xff]  ;;  %v322_v35 = vld [vmem:[%s2045_s1 + $0x60] sm:$0xff]  ;;  %v323_v36 = vld [vmem:[%s2045_s1 + $0x68] sm:$0xff]  ;;  %p1397_p0 = pneg %p1396_p13 }
  0x1a   : > { %s1178_s14 = sshll.u32 %s1606_s13, 5  ;;  %563 = vperm.xlu1 %1393, %v525_v12   ;;  %v324_v37 = vld [vmem:[%s2045_s1 + $0x70] sm:$0xff]  ;;  %v325_v38 = vld [vmem:[%s2045_s1 + $0x78] sm:$0xff]  ;;  %v822_v41 = vld [vmem:[%s2046_s2] sm:$0xff] }
  0x1b   : > { %s297_s17 = scalar_lea.vmem %s2044_s0, %s1178_s14  ;;  %558 = vperm.xlu0 %1392, %v524_v13   ;;  %1284 = vmatprep.mubr.f32.mxu1 %v822_v41 }
  0x1c   : > { %v1620_v4 = vld [vmem:[%s297_s17] sm:$0xff]  ;;  %v1622_v5 = vld [vmem:[%s297_s17 + $0x8] sm:$0xff]  ;;  %v1624_v6 = vld [vmem:[%s297_s17 + $0x10] sm:$0xff] }
  0x1d   : > { %v1290_v7 = vpack.c.bf16 %v1622_v5, %v1620_v4  ;;  %v1628_v8 = vld [vmem:[%s297_s17 + $0x18] sm:$0xff]  ;;  %s1400_s17 = scalar_lea.vmem %s1399_s16, 32 }
  0x1e   : > { %v1294_v10 = vpack.c.bf16 %v1628_v8, %v1624_v6  ;;  %573 = vperm.xlu1 %1393, %v527_v16   ;;  %p1402_p2 = scmp.lt.s32.totalorder %s1400_s17, %s1394_s12 }
  0x1f   : > { %1291 = vmatprep.subr.bf16.mxu0 %v1290_v7  ;;  %568 = vperm.xlu0 %1392, %v526_v17  }
  0x20   : > { %1293 = vmatpush3.bf16.msra.mxu0 %v1290_v7  ;;  %p1403_p3 = por %p1402_p2, %p1401_p1 }
  0x21   : > { %1295 = vmatprep.subr.bf16.mxu0 %v1294_v10 }
  0x22   : > { %583 = vperm.xlu1 %1393, %v529_v20   ;;  %p1404_p5 = pnand %p1403_p3, %p1397_p0 }
  0x23   : > { %578 = vperm.xlu0 %1392, %v528_v21  }
  0x24   : > { %1297 = vmatpush3.bf16.msra.mxu0 %v1294_v10 }
  0x26   : > { %593 = vperm.xlu1 %1393, %v531_v24  }
  0x27   : > { %1229 = vmatmul.mubr.msk.f32.vlgmr.msra.gmra.mrb[0].mxu0 %vm326_vm0, %v311_v14  ;;  %588 = vperm.xlu0 %1392, %v530_v25  }
  0x28   : > { %1231 = vmatprep.mubr.msk.f32.mxu0 %vm326_vm0, %v312_v15 }
  0x2a   : > { %603 = vperm.xlu1 %1393, %v533_v28  }
  0x2b   : > { %1232 = vmatmul.mubr.msk.f32.gmra.mrb[2].mxu0 %vm326_vm0, %v313_v18  ;;  %598 = vperm.xlu0 %1392, %v532_v29  }
  0x2c   : > { %1234 = vmatprep.mubr.msk.f32.mxu0 %vm326_vm0, %v314_v19 }
  0x2e   : > { %613 = vperm.xlu1 %1393, %v535_v32  }
  0x2f   : > { %1235 = vmatmul.mubr.msk.f32.gmra.mrb[4].mxu0 %vm326_vm0, %v315_v22  ;;  %608 = vperm.xlu0 %1392, %v534_v33  }
  0x30   : > { %1237 = vmatprep.mubr.msk.f32.mxu0 %vm326_vm0, %v316_v23 }
  0x33   : > { %1238 = vmatmul.mubr.msk.f32.gmra.mrb[6].mxu0 %vm326_vm0, %v317_v26 }
  0x34   : > { %1240 = vmatprep.mubr.msk.f32.mxu0 %vm326_vm0, %v318_v27 }
  0x37   : > { %1241 = vmatmul.mubr.msk.f32.gmra.mrb[8].mxu0 %vm326_vm0, %v319_v30 }
  0x38   : > { %1243 = vmatprep.mubr.msk.f32.mxu0 %vm326_vm0, %v320_v31 }
  0x3b   : > { %1244 = vmatmul.mubr.msk.f32.gmra.mrb[10].mxu0 %vm326_vm0, %v321_v34 }
  0x3c   : > { %1246 = vmatprep.mubr.msk.f32.mxu0 %vm326_vm0, %v322_v35 }
  0x3f   : > { %1247 = vmatmul.mubr.msk.f32.gmra.mrb[12].mxu0 %vm326_vm0, %v323_v36 }
  0x40   : > { %1249 = vmatprep.mubr.msk.f32.mxu0 %vm326_vm0, %v324_v37 }
  0x43   : > { %1250 = vmatmul.mubr.msk.f32.gmra.mrb[14].mxu0 %vm326_vm0, %v325_v38 }
  0x91   : > { %v549_v39 = vpop.permute.xlu1 %548 }
  0x92   : > { %v539_v40 = vpop.permute.xlu0 %538 }
  0x95   : > { %v554_v42 = vpop.permute.xlu1 %553 }
  0x96   : > { %v544_v43 = vpop.permute.xlu0 %543 }
  0x99   : > { %v564_v44 = vpop.permute.xlu1 %563 }
  0x9a   : > { %v559_v45 = vpop.permute.xlu0 %558 }
  0x9d   : > { %v574_v48 = vpop.permute.xlu1 %573 }
  0x9e   : > { %v569_v50 = vpop.permute.xlu0 %568 }
  0xa1   : > { %v584_v57 = vpop.permute.xlu1 %583 }
  0xa2   : > { %v579_v59 = vpop.permute.xlu0 %578 }
  0xa5   : > { %v594_v14 = vpop.permute.xlu1 %593 }
  0xa6   : > { %v589_v19 = vpop.permute.xlu0 %588 }
  0xa9   : > { %v604_v31 = vpop.permute.xlu1 %603 }
  0xaa   : > { %v599_v33 = vpop.permute.xlu0 %598 }
  0xfa   : > { %v1230_v46 = vpop.f32.mrb[0].mxu0 }
  0xfb   : > { %v441_v47 = vpop.f32.mrb[1].mxu0  ;;  %v1737_v52 = vadd.f32 %v1230_v46, %v544_v43  ;;  %v614_v43 = vpop.permute.xlu1 %613 }
  0xfc   : > { %v1739_v53 = vadd.f32 %v539_v40, %v441_v47  ;;  %v609_v47 = vpop.permute.xlu0 %608 }
  0xfd   : > { %v634_v60 = vsel %vm632_vm1, %v1737_v52, inf }
  0xfe   : > { %v1233_v49 = vpop.f32.mrb[2].mxu0  ;;  %v633_v63 = vsel %vm632_vm1, %v1739_v53, inf }
  0xff   : > { %v451_v51 = vpop.f32.mrb[3].mxu0  ;;  %v1747_v61 = vadd.f32 %v1233_v49, %v554_v42 }
 0x100   : > { %v1753_v0 = vadd.f32 %v549_v39, %v451_v51 }
 0x101   : > { %v636_v12 = vsel %vm632_vm1, %v1747_v61, inf }
 0x102   : > { %v1236_v54 = vpop.f32.mrb[4].mxu0  ;;  %v635_v15 = vsel %vm632_vm1, %v1753_v0, inf }
 0x103   : > { %v1741_v55 = vadd.f32 %v1236_v54, %v564_v44  ;;  %v461_v56 = vpop.f32.mrb[5].mxu0 }
 0x104   : > { %v1743_v58 = vadd.f32 %v559_v45, %v461_v56 }
 0x105   : > { %v639_v62 = vsel %vm632_vm1, %v1741_v55, inf }
 0x106   : > { %v640_v1 = vmin.f32 %v634_v60, %v639_v62  ;;  %v637_v2 = vsel %vm632_vm1, %v1743_v58, inf  ;;  %v1239_v3 = vpop.f32.mrb[6].mxu0 }
 0x107   : > { %v638_v7 = vmin.f32 %v633_v63, %v637_v2  ;;  %v1757_v9 = vadd.f32 %v1239_v3, %v574_v48  ;;  %v471_v10 = vpop.f32.mrb[7].mxu0 }
 0x108   : > { %v1759_v11 = vadd.f32 %v569_v50, %v471_v10 }
 0x109   : > { %v643_v13 = vsel %vm632_vm1, %v1757_v9, inf }
 0x10a   : > { %v644_v16 = vmin.f32 %v636_v12, %v643_v13  ;;  %v641_v17 = vsel %vm632_vm1, %v1759_v11, inf  ;;  %v1242_v18 = vpop.f32.mrb[8].mxu0 }
 0x10b   : > { %v642_v20 = vmin.f32 %v635_v15, %v641_v17  ;;  %v1769_v21 = vadd.f32 %v1242_v18, %v584_v57  ;;  %v481_v22 = vpop.f32.mrb[9].mxu0 }
 0x10c   : > { %v1771_v23 = vadd.f32 %v579_v59, %v481_v22 }
 0x10d   : > { %v647_v24 = vsel %vm632_vm1, %v1769_v21, inf }
 0x10e   : > { %v648_v25 = vmin.f32 %v640_v1, %v647_v24  ;;  %v645_v26 = vsel %vm632_vm1, %v1771_v23, inf  ;;  %v1245_v27 = vpop.f32.mrb[10].mxu0  ;;  %v670_v1 = vlaneseq }
 0x10f   : > { %v646_v28 = vmin.f32 %v638_v7, %v645_v26  ;;  %v1777_v29 = vadd.f32 %v1245_v27, %v594_v14  ;;  %v491_v30 = vpop.f32.mrb[11].mxu0 }
 0x110   : > { %v1779_v32 = vadd.f32 %v589_v19, %v491_v30  ;;  %v1795_v7 = vshrl.u32 %v670_v1, 7 }
 0x111   : > { %v651_v34 = vsel %vm632_vm1, %v1777_v29, inf }
 0x112   : > { %v652_v35 = vmin.f32 %v644_v16, %v651_v34  ;;  %v649_v36 = vsel %vm632_vm1, %v1779_v32, inf  ;;  %v1248_v37 = vpop.f32.mrb[12].mxu0  ;;  %v1798_v13 = vadd.s32 16, %v1795_v7  ;;  %v1801_v15 = vadd.s32 24, %v1795_v7 }
 0x113   : > { %v650_v38 = vmin.f32 %v642_v20, %v649_v36  ;;  %v1785_v39 = vadd.f32 %v1248_v37, %v604_v31  ;;  %v501_v40 = vpop.f32.mrb[13].mxu0  ;;  %v1804_v16 = vadd.s32 48, %v1795_v7  ;;  %v1807_v17 = vadd.s32 56, %v1795_v7 }
 0x114   : > { %v1787_v41 = vadd.f32 %v599_v33, %v501_v40  ;;  %v1810_v18 = vadd.s32 80, %v1795_v7  ;;  %v1813_v19 = vadd.s32 88, %v1795_v7  ;;  %v1816_v20 = vadd.s32 112, %v1795_v7 }
 0x115   : > { %v655_v42 = vsel %vm632_vm1, %v1785_v39, inf  ;;  %v1819_v22 = vadd.s32 120, %v1795_v7  ;;  %v1827_v26 = vadd.s32 32, %v1795_v7  ;;  %v1830_v27 = vadd.s32 40, %v1795_v7 }
 0x116   : > { %v656_v44 = vmin.f32 %v648_v25, %v655_v42  ;;  %v653_v45 = vsel %vm632_vm1, %v1787_v41, inf  ;;  %v1251_v46 = vpop.f32.mrb[14].mxu0  ;;  %v1824_v25 = vadd.s32 8, %v1795_v7  ;;  %v1836_v30 = vadd.s32 72, %v1795_v7 }
 0x117   : > { %v654_v48 = vmin.f32 %v646_v28, %v653_v45  ;;  %v631_v49 = vadd.f32 %v1251_v46, %v614_v43  ;;  %v511_v50 = vpop.f32.mrb[15].mxu0  ;;  %v1833_v28 = vadd.s32 64, %v1795_v7  ;;  %v1839_v31 = vadd.s32 96, %v1795_v7 }
 0x118   : > { %v630_v51 = vadd.f32 %v609_v47, %v511_v50  ;;  %v1842_v33 = vadd.s32 104, %v1795_v7 }
 0x119   : > { %v661_v54 = vmin.f32 %v654_v48, %v656_v44  ;;  %v659_v56 = vsel %vm632_vm1, %v631_v49, inf }
 0x11a   : > { %v660_v57 = vmin.f32 %v652_v35, %v659_v56  ;;  %v657_v59 = vsel %vm632_vm1, %v630_v51, inf }
 0x11b   : > { %v658_v60 = vmin.f32 %v650_v38, %v657_v59 }
 0x11d   : > { %v662_v62 = vmin.f32 %v658_v60, %v660_v57 }
 0x11f   : > { %v663_v63 = vmin.f32 %v661_v54, %v662_v62 }
 0x121   : > { %v664_v2 = vrot.slane %v663_v63, 4 }
 0x123   : > { %v665_v3 = vmin.f32 %v663_v63, %v664_v2 }
 0x125   : > { %v666_v10 = vrot.slane %v665_v3, 2 }
 0x127   : > { %v667_v12 = vmin.f32 %v665_v3, %v666_v10 }
 0x129   : > { %v668_v14 = vrot.slane %v667_v12, 1 }
 0x12b   : > { %v1821_v24 = vmin.f32 %v667_v12, %v668_v14 }
 0x12d   : > { %vm689_vm2 = vcmp.le.f32.partialorder %v1753_v0, %v1821_v24  ;;  %vm690_vm3 = vcmp.le.f32.partialorder %v1747_v61, %v1821_v24  ;;  %vm693_vm4 = vcmp.le.f32.partialorder %v1759_v11, %v1821_v24  ;;  %vm694_vm5 = vcmp.le.f32.partialorder %v1757_v9, %v1821_v24 }
 0x12e   : > { %vm697_vm6 = vcmp.le.f32.partialorder %v1779_v32, %v1821_v24  ;;  %vm698_vm7 = vcmp.le.f32.partialorder %v1777_v29, %v1821_v24  ;;  %vm701_vm8 = vcmp.le.f32.partialorder %v630_v51, %v1821_v24  ;;  %vm702_vm9 = vcmp.le.f32.partialorder %v631_v49, %v1821_v24 }
 0x12f   : > { %v705_v0 = vsel %vm689_vm2, %v1798_v13, 128  ;;  %v706_v61 = vsel %vm690_vm3, %v1801_v15, 128  ;;  %v709_v34 = vsel %vm693_vm4, %v1804_v16, 128  ;;  %v710_v11 = vsel %vm694_vm5, %v1807_v17, 128 }
 0x130   : > { %v713_v9 = vsel %vm697_vm6, %v1810_v18, 128  ;;  %v714_v35 = vsel %vm698_vm7, %v1813_v19, 128  ;;  %v717_v32 = vsel %vm701_vm8, %v1816_v20, 128  ;;  %v718_v29 = vsel %vm702_vm9, %v1819_v22, 128 }
 0x131   : > { %v721_v36 = vsel %vm632_vm1, %v705_v0, 2147483647  ;;  %v722_v37 = vsel %vm632_vm1, %v706_v61, 2147483647  ;;  %v729_v38 = vsel %vm632_vm1, %v709_v34, 2147483647  ;;  %vm687_vm10 = vcmp.le.f32.partialorder %v1739_v53, %v1821_v24 }
 0x132   : > { %vm730_vm11 = vcmp.lt.s32.totalorder %v721_v36, %v729_v38  ;;  %v732_v40 = vsel %vm632_vm1, %v710_v11, 2147483647  ;;  %v741_v42 = vsel %vm632_vm1, %v713_v9, 2147483647  ;;  %v744_v43 = vsel %vm632_vm1, %v714_v35, 2147483647 }
 0x133   : > { %v731_v44 = vsel %vm730_vm11, %v721_v36, %v729_v38  ;;  %vm733_vm12 = vcmp.lt.s32.totalorder %v722_v37, %v732_v40  ;;  %v753_v45 = vsel %vm632_vm1, %v717_v32, 2147483647  ;;  %v756_v46 = vsel %vm632_vm1, %v718_v29, 2147483647 }
 0x134   : > { %v734_v47 = vsel %vm733_vm12, %v722_v37, %v732_v40  ;;  %vm742_vm13 = vcmp.lt.s32.totalorder %v731_v44, %v741_v42  ;;  %vm688_vm14 = vcmp.le.f32.partialorder %v1737_v52, %v1821_v24  ;;  %vm691_vm15 = vcmp.le.f32.partialorder %v1743_v58, %v1821_v24 }
 0x135   : > { %v743_v48 = vsel %vm742_vm13, %v731_v44, %v741_v42  ;;  %vm745_vm0 = vcmp.lt.s32.totalorder %v734_v47, %v744_v43  ;;  %vm692_vm2 = vcmp.le.f32.partialorder %v1741_v55, %v1821_v24  ;;  %vm695_vm3 = vcmp.le.f32.partialorder %v1771_v23, %v1821_v24 }
 0x136   : > { %v746_v49 = vsel %vm745_vm0, %v734_v47, %v744_v43  ;;  %vm754_vm4 = vcmp.lt.s32.totalorder %v743_v48, %v753_v45  ;;  %vm696_vm5 = vcmp.le.f32.partialorder %v1769_v21, %v1821_v24  ;;  %vm699_vm6 = vcmp.le.f32.partialorder %v1787_v41, %v1821_v24 }
 0x137   : > { %v755_v52 = vsel %vm754_vm4, %v743_v48, %v753_v45  ;;  %vm757_vm7 = vcmp.lt.s32.totalorder %v746_v49, %v756_v46  ;;  %vm700_vm8 = vcmp.le.f32.partialorder %v1785_v39, %v1821_v24  ;;  %v703_v55 = vsel %vm687_vm10, %v1795_v7, 128 }
 0x138   : > { %v758_v58 = vsel %vm757_vm7, %v746_v49, %v756_v46  ;;  %v704_v23 = vsel %vm688_vm14, %v1824_v25, 128  ;;  %v707_v50 = vsel %vm691_vm15, %v1827_v26, 128  ;;  %v708_v21 = vsel %vm692_vm2, %v1830_v27, 128 }
 0x139   : > { %vm761_vm9 = vcmp.lt.s32.totalorder %v755_v52, %v758_v58  ;;  %v711_v51 = vsel %vm695_vm3, %v1833_v28, 128  ;;  %v712_v56 = vsel %vm696_vm5, %v1836_v30, 128  ;;  %v719_v39 = vsel %vm632_vm1, %v703_v55, 2147483647 }
 0x13a   : > { %v762_v54 = vsel %vm761_vm9, %v755_v52, %v758_v58  ;;  %v720_v57 = vsel %vm632_vm1, %v704_v23, 2147483647  ;;  %v723_v53 = vsel %vm632_vm1, %v707_v50, 2147483647  ;;  %v726_v59 = vsel %vm632_vm1, %v708_v21, 2147483647 }
 0x13b   : > { %v715_v60 = vsel %vm699_vm6, %v1839_v31, 128  ;;  %v716_v62 = vsel %vm700_vm8, %v1842_v33, 128  ;;  %vm724_vm10 = vcmp.lt.s32.totalorder %v719_v39, %v723_v53  ;;  %vm727_vm11 = vcmp.lt.s32.totalorder %v720_v57, %v726_v59 }
 0x13c   : > { %v725_v63 = vsel %vm724_vm10, %v719_v39, %v723_v53  ;;  %v728_v1 = vsel %vm727_vm11, %v720_v57, %v726_v59  ;;  %v735_v2 = vsel %vm632_vm1, %v711_v51, 2147483647  ;;  %v738_v3 = vsel %vm632_vm1, %v712_v56, 2147483647 }
 0x13d   : > { %vm736_vm12 = vcmp.lt.s32.totalorder %v725_v63, %v735_v2  ;;  %vm739_vm13 = vcmp.lt.s32.totalorder %v728_v1, %v738_v3  ;;  %v747_v14 = vsel %vm632_vm1, %v715_v60, 2147483647  ;;  %v750_v41 = vsel %vm632_vm1, %v716_v62, 2147483647 }
 0x13e   : > { %v737_v10 = vsel %vm736_vm12, %v725_v63, %v735_v2  ;;  %v740_v12 = vsel %vm739_vm13, %v728_v1, %v738_v3  ;;  %vm936_vm5 = vcmask 57344   ;;  %v1507_v37 = vmov 1.0|1.0  }
 0x13f   : > { %vm748_vm14 = vcmp.lt.s32.totalorder %v737_v10, %v747_v14  ;;  %vm751_vm15 = vcmp.lt.s32.totalorder %v740_v12, %v750_v41 }
 0x140   : > { %v749_v24 = vsel %vm748_vm14, %v737_v10, %v747_v14  ;;  %v752_v0 = vsel %vm751_vm15, %v740_v12, %v750_v41 }
 0x141   : > { %vm759_vm0 = vcmp.lt.s32.totalorder %v749_v24, %v752_v0 }
 0x142   : > { %v760_v61 = vsel %vm759_vm0, %v749_v24, %v752_v0 }
 0x143   : > { %vm763_vm2 = vcmp.lt.s32.totalorder %v760_v61, %v762_v54 }
 0x144   : > { %v764_v34 = vsel %vm763_vm2, %v760_v61, %v762_v54 }
 0x145   : > { %v765_v11 = vrot.slane %v764_v34, 4 }
 0x147   : > { %vm766_vm3 = vcmp.lt.s32.totalorder %v764_v34, %v765_v11 }
 0x148   : > { %v767_v9 = vsel %vm766_vm3, %v764_v34, %v765_v11 }
 0x149   : > { %v768_v35 = vrot.slane %v767_v9, 2 }
 0x14b   : > { %vm769_vm4 = vcmp.lt.s32.totalorder %v767_v9, %v768_v35 }
 0x14c   : > { %v770_v32 = vsel %vm769_vm4, %v767_v9, %v768_v35 }
 0x14d   : > { %v771_v29 = vrot.slane %v770_v32, 1 }
 0x14f   : > { %vm772_vm6 = vcmp.lt.s32.totalorder %v770_v32, %v771_v29 }
 0x150   : > { %v773_v36 = vsel %vm772_vm6, %v770_v32, %v771_v29 }
 0x151   : > { %vm774_vm7 = vcmp.eq.s32.totalorder %v1795_v7, %v773_v36  ;;  %vm775_vm8 = vcmp.eq.s32.totalorder %v1824_v25, %v773_v36  ;;  %vm776_vm9 = vcmp.eq.s32.totalorder %v1798_v13, %v773_v36  ;;  %vm777_vm10 = vcmp.eq.s32.totalorder %v1801_v15, %v773_v36  ;;  %938 = vst.msk [vmem:[%s289_s30] sm:$0x1] %vm936_vm5, %v773_v36  ;;  %v823_v7 = vld [vmem:[%s2046_s2 + $0x8] sm:$0xff]  ;;  %v824_v13 = vld [vmem:[%s2046_s2 + $0x10] sm:$0xff]  ;;  %v825_v15 = vld [vmem:[%s2046_s2 + $0x18] sm:$0xff] }
 0x152   : > { %vm1298_vm11 = vmpackc.low %vm775_vm8, %vm774_vm7  ;;  %vm778_vm13 = vcmp.eq.s32.totalorder %v1827_v26, %v773_v36  ;;  %vm779_vm14 = vcmp.eq.s32.totalorder %v1830_v27, %v773_v36  ;;  %vm780_vm0 = vcmp.eq.s32.totalorder %v1804_v16, %v773_v36  ;;  %vm781_vm2 = vcmp.eq.s32.totalorder %v1807_v17, %v773_v36 }
 0x153   : > { %1299 = vmatprep.subr.msk.bf16.mxu1 %vm1298_vm11, %v1507_v37  ;;  %vm1302_vm12 = vmpackc.low %vm777_vm10, %vm776_vm9  ;;  %vm782_vm4 = vcmp.eq.s32.totalorder %v1833_v28, %v773_v36  ;;  %vm783_vm6 = vcmp.eq.s32.totalorder %v1836_v30, %v773_v36  ;;  %vm784_vm8 = vcmp.eq.s32.totalorder %v1810_v18, %v773_v36  ;;  %vm785_vm9 = vcmp.eq.s32.totalorder %v1813_v19, %v773_v36 }
 0x154   : > { %1301 = vmatpush3.bf16.msk.msra.mxu1 %vm1298_vm11, %v1507_v37  ;;  %vm1306_vm15 = vmpackc.low %vm779_vm14, %vm778_vm13  ;;  %vm786_vm11 = vcmp.eq.s32.totalorder %v1839_v31, %v773_v36  ;;  %vm788_vm14 = vcmp.eq.s32.totalorder %v1816_v20, %v773_v36 }
 0x155   : > { %1303 = vmatprep.subr.msk.bf16.mxu1 %vm1302_vm12, %v1507_v37  ;;  %vm1310_vm3 = vmpackc.low %vm781_vm2, %vm780_vm0 }
 0x156   : > { %vm1314_vm7 = vmpackc.low %vm783_vm6, %vm782_vm4 }
 0x157   : > { %vm1318_vm10 = vmpackc.low %vm785_vm9, %vm784_vm8 }
 0x158   : > { %1305 = vmatpush3.bf16.msk.msra.mxu1 %vm1302_vm12, %v1507_v37  ;;  %vm787_vm12 = vcmp.eq.s32.totalorder %v1842_v33, %v773_v36 }
 0x159   : > { %1307 = vmatprep.subr.msk.bf16.mxu1 %vm1306_vm15, %v1507_v37  ;;  %vm1322_vm13 = vmpackc.low %vm787_vm12, %vm786_vm11 }
 0x15c   : > { %1309 = vmatpush3.bf16.msk.msra.mxu1 %vm1306_vm15, %v1507_v37  ;;  %vm789_vm15 = vcmp.eq.s32.totalorder %v1819_v22, %v773_v36 }
 0x15d   : > { %1311 = vmatprep.subr.msk.bf16.mxu1 %vm1310_vm3, %v1507_v37  ;;  %vm1326_vm0 = vmpackc.low %vm789_vm15, %vm788_vm14 }
 0x160   : > { %1313 = vmatpush3.bf16.msk.msra.mxu1 %vm1310_vm3, %v1507_v37 }
 0x161   : > { %1315 = vmatprep.subr.msk.bf16.mxu1 %vm1314_vm7, %v1507_v37 }
 0x164   : > { %1317 = vmatpush3.bf16.msk.msra.mxu1 %vm1314_vm7, %v1507_v37 }
 0x165   : > { %1319 = vmatprep.subr.msk.bf16.mxu1 %vm1318_vm10, %v1507_v37 }
 0x168   : > { %1321 = vmatpush3.bf16.msk.msra.mxu1 %vm1318_vm10, %v1507_v37 }
 0x169   : > { %1323 = vmatprep.subr.msk.bf16.mxu1 %vm1322_vm13, %v1507_v37 }
 0x16c   : > { %1325 = vmatpush3.bf16.msk.msra.mxu1 %vm1322_vm13, %v1507_v37 }
 0x16d   : > { %1327 = vmatprep.subr.msk.bf16.mxu1 %vm1326_vm0, %v1507_v37 }
 0x170   : > { %1329 = vmatpush3.bf16.msk.msra.mxu1 %vm1326_vm0, %v1507_v37 }
 0x173   : > { %1285 = vmatmul.mubr.f32.vlgmr.msra.gmra.mrb[0].mxu1 %v823_v7 }
 0x174   : > { %1287 = vmatprep.mubr.f32.mxu1 %v824_v13 }
 0x177   : > { %1288 = vmatmul.mubr.f32.gmra.mrb[2].mxu1 %v825_v15 }
 0x178   : > { %1407 = shalt.err (!%p1404_p5)
}
 0x179   : > { %s1408_s30 = scalar_lea.hbm %s1950_s27, 16  ;;  %s1412_s15 = scalar_lea.hbm %s2050_s6, 32 }
 0x17a   : > { %p1409_p6 = scmp.ne.s32.totalorder %s1950_s27, %s1408_s30  ;;  %p1413_p10 = scmp.lt.u32.totalorder %s1950_s27, %s2050_s6 }
 0x17b   : > { %p1414_p11 = scmp.lt.u32.totalorder %s1412_s15, %s1408_s30  ;;  %p1416_p13 = scmp.lt.u32.totalorder %s1408_s30, %s1950_s27 }
 0x17c   : > { %p1410_p7 = pnand %p1409_p6, %p1585_p4 }
 0x17d   : > { %p1415_p12 = por %p1414_p11, %p1413_p10 }
 0x17e   : > { %p1411_p9 = pneg %p1410_p7 }
 0x17f   : > { %p1417_p0 = por %p1416_p13, %p1415_p12 }
 0x181   : > { %p1418_p1 = pnand %p1417_p0, %p1411_p9 }
 0x183   : > { %1421 = shalt.err (!%p1418_p1)
}
 0x184   : > { %1331 = dma.vmem_to_hbm [thread:$0]  (%p1585_p4), %s983_s8, 16, %s1950_s27, %s952_s11  }
 0x185   : > { %s305_s19 = scalar_lea.vmem %s2048_s4, %s1178_s14  ;;  %s283_s13 = scalar_lea.vmem [#allocation2], %s1913_s28 }
 0x186   : > { %s968_s14 = sshll.u32 %s283_s13, 4  ;;  %s2054_s18 = sshll.u32 %s1496_s24, 4  ;;  %s1997_s14 = int_to_ptr.vmem [resolvable:$true] %s968_s14 }
 0x187   : > { %s1995_s11 = scalar_lea.hbm %s2049_s5, %s2054_s18  ;;  %s948_s30 = scalar_lea.sflag [#allocation3], %s1913_s28 }
 0x188   : > { %s1422_s20 = scalar_lea.vmem %s1997_s14, 16  ;;  %s1509_s15 = smov [#allocation2]  }
 0x189   : > { %p1423_p2 = scmp.ne.s32.totalorder %s1997_s14, %s1422_s20  ;;  %s1426_s24 = sshll.u32 %s1509_s15, 4  ;;  %s1427_s24 = int_to_ptr.vmem [resolvable:$false] %s1426_s24 }
 0x18a   : > { %s1428_s16 = scalar_lea.vmem %s1427_s24, 32  ;;  %p1429_p6 = scmp.lt.s32.totalorder %s1997_s14, %s1427_s24 }
 0x18b   : > { %p1424_p3 = pnand %p1423_p2, %p1585_p4  ;;  %p1430_p7 = scmp.lt.s32.totalorder %s1428_s16, %s1422_s20 }
 0x18d   : > { %p1425_p5 = pneg %p1424_p3  ;;  %p1431_p9 = por %p1430_p7, %p1429_p6 }
 0x18f   : > { %p1432_p10 = pnand %p1431_p9, %p1425_p5 }
 0x246   : > { %v1286_v16 = vpop.f32.mrb[0].mxu1 }
 0x247   : > { %912 = vst.msk [vmem:[%s305_s19 + $0x8] sm:$0xff] %vm632_vm1, %v1286_v16  ;;  %v916_v17 = vsub.f32 %v1286_v16, %v1622_v5  ;;  %v892_v18 = vpop.f32.mrb[1].mxu1 }
 0x248   : > { %911 = vst.msk [vmem:[%s305_s19] sm:$0xff] %vm632_vm1, %v892_v18  ;;  %v915_v19 = vsub.f32 %v892_v18, %v1620_v4 }
 0x249   : > { %v920_v20 = vmul.f32 %v916_v17, %v916_v17 }
 0x24a   : > { %v919_v22 = vmul.f32 %v915_v19, %v915_v19  ;;  %v1289_v25 = vpop.f32.mrb[2].mxu1 }
 0x24b   : > { %v924_v26 = vsel %vm632_vm1, %v920_v20, 0.0  ;;  %914 = vst.msk [vmem:[%s305_s19 + $0x18] sm:$0xff] %vm632_vm1, %v1289_v25  ;;  %v918_v27 = vsub.f32 %v1289_v25, %v1628_v8  ;;  %v902_v28 = vpop.f32.mrb[3].mxu1 }
 0x24c   : > { %v923_v30 = vsel %vm632_vm1, %v919_v22, 0.0  ;;  %913 = vst.msk [vmem:[%s305_s19 + $0x10] sm:$0xff] %vm632_vm1, %v902_v28  ;;  %v917_v5 = vsub.f32 %v902_v28, %v1624_v6 }
 0x24d   : > { %v925_v31 = vadd.f32 %v924_v26, %v923_v30  ;;  %v922_v4 = vmul.f32 %v918_v27, %v918_v27 }
 0x24e   : > { %v921_v33 = vmul.f32 %v917_v5, %v917_v5 }
 0x24f   : > { %v928_v42 = vsel %vm632_vm1, %v922_v4, 0.0 }
 0x250   : > { %v926_v38 = vsel %vm632_vm1, %v921_v33, 0.0 }
 0x251   : > { %v927_v40 = vadd.f32 %v926_v38, %v925_v31 }
 0x253   : > { %v929_v8 = vadd.f32 %v928_v42, %v927_v40 }
 0x255   : > { %v930_v43 = vrot.slane %v929_v8, 4 }
 0x257   : > { %v931_v44 = vadd.f32 %v930_v43, %v929_v8 }
 0x259   : > { %v932_v45 = vrot.slane %v931_v44, 2 }
 0x25b   : > { %v933_v46 = vadd.f32 %v932_v45, %v931_v44 }
 0x25d   : > { %v934_v47 = vrot.slane %v933_v46, 1 }
 0x25f   : > { %v935_v6 = vadd.f32 %v934_v47, %v933_v46 }
 0x261   : > { %937 = vst.msk [vmem:[%s283_s13] sm:$0x1] %vm936_vm5, %v935_v6 }
 0x262   : > { %1435 = shalt.err (!%p1432_p10)
}
 0x263   : > { %s1436_s28 = scalar_lea.hbm %s1995_s11, 16  ;;  %s1440_s19 = scalar_lea.hbm %s2049_s5, 32 }
 0x264   : > { %p1437_p11 = scmp.ne.s32.totalorder %s1995_s11, %s1436_s28  ;;  %p1441_p0 = scmp.lt.u32.totalorder %s1995_s11, %s2049_s5 }
 0x265   : > { %p1442_p1 = scmp.lt.u32.totalorder %s1440_s19, %s1436_s28  ;;  %p1444_p3 = scmp.lt.u32.totalorder %s1436_s28, %s1995_s11 }
 0x266   : > { %p1438_p12 = pnand %p1437_p11, %p1585_p4 }
 0x267   : > { %p1443_p2 = por %p1442_p1, %p1441_p0 }
 0x268   : > { %p1439_p13 = pneg %p1438_p12 }
 0x269   : > { %p1445_p5 = por %p1444_p3, %p1443_p2 }
 0x26b   : > { %p1446_p6 = pnand %p1445_p5, %p1439_p13 }
 0x26d   : > { %1449 = shalt.err (!%p1446_p6)
}
 0x26e   : > { %1330 = dma.vmem_to_hbm [thread:$0]  (%p1585_p4), %s1997_s14, 16, %s1995_s11, %s948_s30  }
 0x26f PF: > { %p1341_p7 = scmp.ge.s32.totalorder %s1504_s26, 2  ;;  %s1005_s27 = sand.u32 1, %s1484_s21  }
 0x270   : > { %s1006_s8 = scalar_lea.sflag [#allocation3], %s1005_s27 }
 0x271   : > { %p1335_p9 = pnand %p1341_p7, %p1592_p8 }
 0x273   : > { %1475 = dma.done.wait (!%p1335_p9), %s1006_s8, 16  }
 0x274   : > { %1477 = vsyncadd (!%p1335_p9), %s1006_s8, 4294967280  ;;  %s1014_s20 = scalar_lea.sflag [#allocation5], %s1005_s27 }
 0x275   : > { %1479 = dma.done.wait (!%p1335_p9), %s1014_s20, 16  }
 0x276   : > { %1481 = vsyncadd (!%p1335_p9), %s1014_s20, 4294967280  ;;  %s23_s26 = sadd.s32 1, %s1504_s26   ;;  %s2055_s21 = smov %s1488_s22 }
 0x277   : > { %p20_p10 = scmp.ge.s32.totalorder %s23_s26, 4   ;;  %s2056_s22 = smov %s1492_s23 }
 0x278   : > { %s2057_s23 = smov %s1598_s10  ;;  %s2058_s24 = smov %s1500_s25 }
 0x279   : > { %s2059_s25 = smov %s2061_s29  ;;  %22 = sbr.rel (!%p20_p10) target bundleno = 6 (0x6), region = 100 }
 0x280   :  { %1018 = vsyncpa [#allocation3], 1 }
 0x281   :  { %1020 = vsyncpa [#allocation3 + $0x1], 1 }
 0x282   :  { %1021 = vsyncpa [#allocation5], 1 }
 0x283   :  { %1023 = vsyncpa [#allocation5 + $0x1], 1 }

</bundles_post_ra>
